<compile_context>
chip_gen: v7x
topology: tpu7x:2x2x1
jax: 0.10.0
libtpu: 0.0.40
codegen_flags: <defaults>
</compile_context>

<pallas_src>
import math
from collections import namedtuple

import numpy as np
import jax
import jax.numpy as jnp
from jax.experimental import pallas as pl
from jax.experimental.pallas import tpu as pltpu

Sample = namedtuple("Sample", "trajectories values chains")


# ----------------------------------------------------------------------------
# Diffusion schedule (numpy, identical to diffuser's cosine_beta_schedule:
# np.linspace(0, steps, steps) with steps = timesteps + 1, matching the repo).
# ----------------------------------------------------------------------------
def cosine_beta_schedule(timesteps, s=0.008, dtype=np.float32):
    steps = timesteps + 1
    x = np.linspace(0, steps, steps)
    alphas_cumprod = np.cos(((x / steps) + s) / (1 + s) * np.pi * 0.5) ** 2
    alphas_cumprod = alphas_cumprod / alphas_cumprod[0]
    betas = 1 - (alphas_cumprod[1:] / alphas_cumprod[:-1])
    return np.clip(betas, a_min=0, a_max=0.999).astype(dtype)


def make_step_coefs(n_timesteps):
    """Per-timestep scalar table [T, 8] (cols 0..4 used):
         0: sqrt_recip_alphas_cumprod      (a   in x_recon = a*x - s*eps)
         1: sqrt_recipm1_alphas_cumprod    (s)
         2: posterior_mean_coef1           (c1  in mean = c1*x_recon + c2*x)
         3: posterior_mean_coef2           (c2)
         4: exp(0.5*posterior_log_var)     (std; zeroed at t==0, default_sample_fn)
    """
    betas = cosine_beta_schedule(n_timesteps).astype(np.float64)
    alphas = 1.0 - betas
    alphas_cumprod = np.cumprod(alphas, axis=0)
    alphas_cumprod_prev = np.concatenate([np.ones(1), alphas_cumprod[:-1]])

    sqrt_recip = np.sqrt(1.0 / alphas_cumprod)
    sqrt_recipm1 = np.sqrt(1.0 / alphas_cumprod - 1.0)
    post_var = betas * (1.0 - alphas_cumprod_prev) / (1.0 - alphas_cumprod)
    post_logvar = np.log(np.clip(post_var, a_min=1e-20, a_max=None))
    coef1 = betas * np.sqrt(alphas_cumprod_prev) / (1.0 - alphas_cumprod)
    coef2 = (1.0 - alphas_cumprod_prev) * np.sqrt(alphas) / (1.0 - alphas_cumprod)
    std = np.exp(0.5 * post_logvar)
    std[0] = 0.0  # noise[t == 0] = 0 in default_sample_fn

    table = np.zeros((n_timesteps, 8), np.float32)
    table[:, 0] = sqrt_recip
    table[:, 1] = sqrt_recipm1
    table[:, 2] = coef1
    table[:, 3] = coef2
    table[:, 4] = std
    return table


# ----------------------------------------------------------------------------
# Fused denoising kernel: one grid step == one diffusion timestep (reversed).
#   x_recon = a * x - s * eps            (predict_start_from_noise, eps mode)
#   mean    = c1 * x_recon + c2 * x      (q_posterior mean)
#   x_new   = mean + std * noise         (std already 0 at t == 0)
#   x_new   = where(cond_mask, cond, x_new)   (apply_conditioning)
# The trajectory x stays in a VMEM scratch across all grid steps; only the final
# x is written to the output block.
# ----------------------------------------------------------------------------
def fused_denoise_kernel(coef_ref, x0_ref, cond_ref, mask_ref,
                         w1_ref, b1_ref, w2_ref, b2_ref, noise_ref,
                         out_ref, x_state):
    s = pl.program_id(0)
    num_t = pl.num_programs(0)
    t = num_t - 1 - s  # reversed(range(n_timesteps))

    # step 0: load initial Gaussian trajectory and apply conditioning
    @pl.when(s == 0)
    def _():
        x_state[...] = jnp.where(mask_ref[...] > 0.5, cond_ref[...], x0_ref[...])

    x = x_state[...]  # [B*H, D] f32, resident in VMEM

    # --- epsilon model: 2-layer MLP, time embedding pre-folded into b1 table ---
    b1t = b1_ref[pl.ds(t, 1), :]  # [1, Hd] = b1 + time_embedding(t)
    h = jnp.dot(x.astype(jnp.bfloat16), w1_ref[...],
                preferred_element_type=jnp.float32)
    h = jnp.tanh(h + b1t)
    eps = jnp.dot(h.astype(jnp.bfloat16), w2_ref[...],
                  preferred_element_type=jnp.float32) + b2_ref[...]

    # --- fused p_sample update (scalars from the SMEM coefficient table) ---
    a = coef_ref[t, 0]
    sc = coef_ref[t, 1]
    c1 = coef_ref[t, 2]
    c2 = coef_ref[t, 3]
    std = coef_ref[t, 4]

    x_recon = a * x - sc * eps
    mean = c1 * x_recon + c2 * x
    x_new = mean + std * noise_ref[0]

    # apply_conditioning after every step (exact overwrite of conditioned slots)
    x_state[...] = jnp.where(mask_ref[...] > 0.5, cond_ref[...], x_new)

    # write the trajectory back to HBM once, on the last step
    @pl.when(s == num_t - 1)
    def _():
        out_ref[...] = x_state[...]


# ----------------------------------------------------------------------------
# GaussianDiffusion wrapper (forward == conditional_sample)
# ----------------------------------------------------------------------------
class GaussianDiffusionPallas:
    def __init__(self, horizon, observation_dim, action_dim, n_timesteps,
                 hidden_dim, key):
        self.horizon = horizon
        self.observation_dim = observation_dim
        self.action_dim = action_dim
        self.transition_dim = observation_dim + action_dim
        self.n_timesteps = n_timesteps
        self.hidden_dim = hidden_dim

        # [T, 8] per-timestep scalar coefficients (SMEM table in the kernel)
        self.coefs = jnp.asarray(make_step_coefs(n_timesteps))

        # deterministic synthetic epsilon-model parameters
        k1, k2, k3, k4 = jax.random.split(key, 4)
        D, Hd = self.transition_dim, hidden_dim
        w1 = jax.random.normal(k1, (D, Hd), jnp.float32) * (1.0 / math.sqrt(D))
        b1 = jax.random.normal(k2, (1, Hd), jnp.float32) * 0.01
        w2 = jax.random.normal(k3, (Hd, D), jnp.float32) * (1.0 / math.sqrt(Hd))
        b2 = jax.random.normal(k4, (1, D), jnp.float32) * 0.01

        # precompute sinusoidal time embedding and fold into per-timestep bias [T, Hd]
        half = Hd // 2
        freqs = np.exp(-math.log(10000.0) * np.arange(half, dtype=np.float64) / half)
        ts = np.arange(n_timesteps, dtype=np.float64)[:, None]
        temb = np.concatenate([np.sin(ts * freqs), np.cos(ts * freqs)], axis=1)
        self.bias1_table = jnp.asarray(temb, jnp.float32) + b1  # [T, Hd] f32

        # bf16 weights for the MXU (f32 accumulation inside the kernel)
        self.w1 = w1.astype(jnp.bfloat16)
        self.w2 = w2.astype(jnp.bfloat16)
        self.b2 = b2  # f32

    # ------------------------------------------------------------------
    def p_sample_loop(self, shape, cond, rng):
        B, H, D = shape
        BH = B * H
        T = self.n_timesteps
        Hd = self.hidden_dim

        rng, k_init, k_noise = jax.random.split(rng, 3)
        # initial trajectory noise + all per-step noise generated up front
        x0 = jax.random.normal(k_init, (BH, D), jnp.float32)
        noise_all = jax.random.normal(k_noise, (T, BH, D), jnp.float32)

        # conditioning values & mask (apply_conditioning fused into the kernel)
        cond_full = jnp.zeros((B, H, D), jnp.float32)
        cond_mask = jnp.zeros((B, H, D), jnp.float32)
        for ts_idx, val in cond.items():
            cond_full = cond_full.at[:, ts_idx, self.action_dim:].set(val)
            cond_mask = cond_mask.at[:, ts_idx, self.action_dim:].set(1.0)
        cond_full = cond_full.reshape(BH, D)
        cond_mask = cond_mask.reshape(BH, D)

        x_final = pl.pallas_call(
            fused_denoise_kernel,
            out_shape=jax.ShapeDtypeStruct((BH, D), jnp.float32),
            grid=(T,),
            in_specs=[
                pl.BlockSpec(memory_space=pltpu.MemorySpace.SMEM),  # coef table [T,8]
                pl.BlockSpec((BH, D), lambda s: (0, 0)),            # x0 (resident)
                pl.BlockSpec((BH, D), lambda s: (0, 0)),            # cond values
                pl.BlockSpec((BH, D), lambda s: (0, 0)),            # cond mask
                pl.BlockSpec((D, Hd), lambda s: (0, 0)),            # w1 (bf16, resident)
                pl.BlockSpec((T, Hd), lambda s: (0, 0)),            # b1 + temb table
                pl.BlockSpec((Hd, D), lambda s: (0, 0)),            # w2 (bf16, resident)
                pl.BlockSpec((1, D), lambda s: (0, 0)),             # b2
                pl.BlockSpec((1, BH, D), lambda s: (s, 0, 0)),      # per-step noise
            ],
            out_specs=pl.BlockSpec((BH, D), lambda s: (0, 0)),
            scratch_shapes=[pltpu.VMEM((BH, D), jnp.float32)],      # resident x state
            compiler_params=pltpu.CompilerParams(
                dimension_semantics=("arbitrary",),   # sequential, state-carrying loop
                vmem_limit_bytes=32 * 1024 * 1024,    # explicit; safe on v5e/v6e/v7x
            ),
        )(self.coefs, x0, cond_full, cond_mask, self.w1, self.bias1_table,
          self.w2, self.b2, noise_all)

        x = x_final.reshape(B, H, D)
        values = jnp.zeros((B,), jnp.float32)
        # TODO(synk): return_chain / Progress verbose logging omitted (side effects only)
        return Sample(x, values, None)

    # ------------------------------------------------------------------
    def forward(self, cond, horizon=None, rng=None):
        # conditional_sample
        batch_size = cond[0].shape[0]
        horizon = horizon or self.horizon
        shape = (batch_size, horizon, self.transition_dim)
        return self.p_sample_loop(shape, cond, rng)


# ----------------------------------------------------------------------------
if __name__ == "__main__":
    B = 2
    horizon = 8
    action_dim = 4
    observation_dim = 12       # transition_dim = 16
    n_timesteps = 8
    hidden_dim = 32

    key = jax.random.PRNGKey(0)
    k_params, k_cond, k_rng = jax.random.split(key, 3)

    diffusion = GaussianDiffusionPallas(
        horizon=horizon,
        observation_dim=observation_dim,
        action_dim=action_dim,
        n_timesteps=n_timesteps,
        hidden_dim=hidden_dim,
        key=k_params,
    )

    # conditioning: fix the observation at timestep 0
    cond = {0: jax.random.normal(k_cond, (B, observation_dim), jnp.float32)}

    sample = diffusion.forward(cond, rng=k_rng)
    traj = jax.block_until_ready(sample.trajectories)
    vals = jax.block_until_ready(sample.values)

    assert traj.shape == (B, horizon, action_dim + observation_dim)
    assert vals.shape == (B,)
    assert bool(jnp.all(jnp.isfinite(traj)))
    # conditioning must be preserved exactly
    assert bool(jnp.allclose(traj[:, 0, action_dim:], cond[0]))

    print("KERNEL_OK")
</pallas_src>

<mosaic_0001>
module attributes {stable_mosaic.version = 11 : i64} {
  func.func @fused_denoise_kernel(%arg0: i32, %arg1: memref<8x8xf32, #tpu.memory_space<smem>>, %arg2: memref<16x16xf32, #tpu.memory_space<vmem>>, %arg3: memref<16x16xf32, #tpu.memory_space<vmem>>, %arg4: memref<16x16xf32, #tpu.memory_space<vmem>>, %arg5: memref<16x32xbf16, #tpu.memory_space<vmem>>, %arg6: memref<8x32xf32, #tpu.memory_space<vmem>>, %arg7: memref<32x16xbf16, #tpu.memory_space<vmem>>, %arg8: memref<1x16xf32, #tpu.memory_space<vmem>>, %arg9: memref<1x16x16xf32, #tpu.memory_space<vmem>>, %arg10: memref<16x16xf32, #tpu.memory_space<vmem>>, %arg11: memref<16x16xf32, #tpu.memory_space<vmem>>) attributes {dimension_semantics = [#tpu.dimension_semantics<arbitrary>], iteration_bounds = array<i64: 8>, scalar_prefetch = 0 : i64, scratch_operands = 1 : i64, tpu.core_type = #tpu.core_type<tc>, window_params = [{transform_indices = @transform_0, window_bounds = array<i64: 8, 8>}, {pipeline_mode = #tpu.pipeline_mode<synchronous>, transform_indices = @transform_1, window_bounds = array<i64: 16, 16>}, {pipeline_mode = #tpu.pipeline_mode<synchronous>, transform_indices = @transform_2, window_bounds = array<i64: 16, 16>}, {pipeline_mode = #tpu.pipeline_mode<synchronous>, transform_indices = @transform_3, window_bounds = array<i64: 16, 16>}, {pipeline_mode = #tpu.pipeline_mode<synchronous>, transform_indices = @transform_4, window_bounds = array<i64: 16, 32>}, {pipeline_mode = #tpu.pipeline_mode<synchronous>, transform_indices = @transform_5, window_bounds = array<i64: 8, 32>}, {pipeline_mode = #tpu.pipeline_mode<synchronous>, transform_indices = @transform_6, window_bounds = array<i64: 32, 16>}, {pipeline_mode = #tpu.pipeline_mode<synchronous>, transform_indices = @transform_7, window_bounds = array<i64: 1, 16>}, {transform_indices = @transform_8, window_bounds = array<i64: 1, 16, 16>}, {pipeline_mode = #tpu.pipeline_mode<synchronous>, transform_indices = @transform_9, window_bounds = array<i64: 16, 16>}]} {
    %c7_i32 = arith.constant 7 : i32
    %0 = arith.subi %c7_i32, %arg0 : i32
    %c0_i32 = arith.constant 0 : i32
    %1 = arith.cmpi eq, %arg0, %c0_i32 : i32
    %2 = arith.extui %1 : i1 to i32
    %c0_i32_0 = arith.constant 0 : i32
    %3 = arith.cmpi ne, %2, %c0_i32_0 : i32
    scf.if %3 {
      %c0_23 = arith.constant 0 : index
      %c0_24 = arith.constant 0 : index
      %53 = vector.load %arg4[%c0_23, %c0_24] : memref<16x16xf32, #tpu.memory_space<vmem>>, vector<16x16xf32>
      %cst_25 = arith.constant 5.000000e-01 : f32
      %54 = vector.broadcast %cst_25 : f32 to vector<16x16xf32>
      %55 = arith.cmpf ogt, %53, %54 : vector<16x16xf32>
      %c0_26 = arith.constant 0 : index
      %c0_27 = arith.constant 0 : index
      %56 = vector.load %arg3[%c0_26, %c0_27] : memref<16x16xf32, #tpu.memory_space<vmem>>, vector<16x16xf32>
      %c0_28 = arith.constant 0 : index
      %c0_29 = arith.constant 0 : index
      %57 = vector.load %arg2[%c0_28, %c0_29] : memref<16x16xf32, #tpu.memory_space<vmem>>, vector<16x16xf32>
      %58 = arith.select %55, %56, %57 : vector<16x16xi1>, vector<16x16xf32>
      %c0_30 = arith.constant 0 : index
      %c0_31 = arith.constant 0 : index
      %59 = vector.load %arg11[%c0_30, %c0_31] : memref<16x16xf32, #tpu.memory_space<vmem>>, vector<16x16xf32>
      tpu.vector_store %arg11[%c0_30, %c0_31], %58 {strides = array<i32>} : memref<16x16xf32, #tpu.memory_space<vmem>>, vector<16x16xf32>,
    } else {
    }
    %c0 = arith.constant 0 : index
    %c0_1 = arith.constant 0 : index
    %4 = vector.load %arg11[%c0, %c0_1] : memref<16x16xf32, #tpu.memory_space<vmem>>, vector<16x16xf32>
    %5 = arith.index_cast %0 : i32 to index
    %c0_2 = arith.constant 0 : index
    %6 = vector.load %arg6[%5, %c0_2] : memref<8x32xf32, #tpu.memory_space<vmem>>, vector<1x32xf32>
    %7 = arith.truncf %4 : vector<16x16xf32> to vector<16x16xbf16>
    %c0_3 = arith.constant 0 : index
    %c0_4 = arith.constant 0 : index
    %8 = vector.load %arg5[%c0_3, %c0_4] : memref<16x32xbf16, #tpu.memory_space<vmem>>, vector<16x32xbf16>
    %cst = arith.constant dense<0.000000e+00> : vector<16x32xf32>
    %9 = tpu.matmul %7, %8, %cst {dimension_numbers = #tpu.dot_dimension_numbers<[1], [0], [0], [1], [0, 0, 1, 1], [], []>} : vector<16x16xbf16>, vector<16x32xbf16>, vector<16x32xf32> -> vector<16x32xf32>
    %10 = vector.broadcast %6 : vector<1x32xf32> to vector<16x32xf32>
    %11 = arith.addf %9, %10 : vector<16x32xf32>
    %12 = math.tanh %11 : vector<16x32xf32>
    %13 = arith.truncf %12 : vector<16x32xf32> to vector<16x32xbf16>
    %c0_5 = arith.constant 0 : index
    %c0_6 = arith.constant 0 : index
    %14 = vector.load %arg7[%c0_5, %c0_6] : memref<32x16xbf16, #tpu.memory_space<vmem>>, vector<32x16xbf16>
    %cst_7 = arith.constant dense<0.000000e+00> : vector<16x16xf32>
    %15 = tpu.matmul %13, %14, %cst_7 {dimension_numbers = #tpu.dot_dimension_numbers<[1], [0], [0], [1], [0, 0, 1, 1], [], []>} : vector<16x32xbf16>, vector<32x16xbf16>, vector<16x16xf32> -> vector<16x16xf32>
    %c0_8 = arith.constant 0 : index
    %c0_9 = arith.constant 0 : index
    %16 = vector.load %arg8[%c0_8, %c0_9] : memref<1x16xf32, #tpu.memory_space<vmem>>, vector<1x16xf32>
    %17 = vector.broadcast %16 : vector<1x16xf32> to vector<16x16xf32>
    %18 = arith.addf %15, %17 : vector<16x16xf32>
    %19 = arith.index_cast %0 : i32 to index
    %c0_10 = arith.constant 0 : index
    %20 = memref.load %arg1[%19, %c0_10] : memref<8x8xf32, #tpu.memory_space<smem>>
    %21 = arith.index_cast %0 : i32 to index
    %c1 = arith.constant 1 : index
    %22 = memref.load %arg1[%21, %c1] : memref<8x8xf32, #tpu.memory_space<smem>>
    %23 = arith.index_cast %0 : i32 to index
    %c2 = arith.constant 2 : index
    %24 = memref.load %arg1[%23, %c2] : memref<8x8xf32, #tpu.memory_space<smem>>
    %25 = arith.index_cast %0 : i32 to index
    %c3 = arith.constant 3 : index
    %26 = memref.load %arg1[%25, %c3] : memref<8x8xf32, #tpu.memory_space<smem>>
    %27 = arith.index_cast %0 : i32 to index
    %c4 = arith.constant 4 : index
    %28 = memref.load %arg1[%27, %c4] : memref<8x8xf32, #tpu.memory_space<smem>>
    %29 = vector.broadcast %20 : f32 to vector<16x16xf32>
    %30 = arith.mulf %29, %4 : vector<16x16xf32>
    %31 = vector.broadcast %22 : f32 to vector<16x16xf32>
    %32 = arith.mulf %31, %18 : vector<16x16xf32>
    %33 = arith.subf %30, %32 : vector<16x16xf32>
    %34 = vector.broadcast %24 : f32 to vector<16x16xf32>
    %35 = arith.mulf %34, %33 : vector<16x16xf32>
    %36 = vector.broadcast %26 : f32 to vector<16x16xf32>
    %37 = arith.mulf %36, %4 : vector<16x16xf32>
    %38 = arith.addf %35, %37 : vector<16x16xf32>
    %c0_11 = arith.constant 0 : index
    %c0_12 = arith.constant 0 : index
    %c0_13 = arith.constant 0 : index
    %39 = vector.load %arg9[%c0_11, %c0_12, %c0_13] : memref<1x16x16xf32, #tpu.memory_space<vmem>>, vector<1x16x16xf32>
    %40 = vector.shape_cast %39 : vector<1x16x16xf32> to vector<16x16xf32>
    %41 = vector.broadcast %28 : f32 to vector<16x16xf32>
    %42 = arith.mulf %41, %40 : vector<16x16xf32>
    %43 = arith.addf %38, %42 : vector<16x16xf32>
    %c0_14 = arith.constant 0 : index
    %c0_15 = arith.constant 0 : index
    %44 = vector.load %arg4[%c0_14, %c0_15] : memref<16x16xf32, #tpu.memory_space<vmem>>, vector<16x16xf32>
    %cst_16 = arith.constant 5.000000e-01 : f32
    %45 = vector.broadcast %cst_16 : f32 to vector<16x16xf32>
    %46 = arith.cmpf ogt, %44, %45 : vector<16x16xf32>
    %c0_17 = arith.constant 0 : index
    %c0_18 = arith.constant 0 : index
    %47 = vector.load %arg3[%c0_17, %c0_18] : memref<16x16xf32, #tpu.memory_space<vmem>>, vector<16x16xf32>
    %48 = arith.select %46, %47, %43 : vector<16x16xi1>, vector<16x16xf32>
    %c0_19 = arith.constant 0 : index
    %c0_20 = arith.constant 0 : index
    %49 = vector.load %arg11[%c0_19, %c0_20] : memref<16x16xf32, #tpu.memory_space<vmem>>, vector<16x16xf32>
    tpu.vector_store %arg11[%c0_19, %c0_20], %48 {strides = array<i32>} : memref<16x16xf32, #tpu.memory_space<vmem>>, vector<16x16xf32>,
    %c7_i32_21 = arith.constant 7 : i32
    %50 = arith.cmpi eq, %arg0, %c7_i32_21 : i32
    %51 = arith.extui %50 : i1 to i32
    %c0_i32_22 = arith.constant 0 : i32
    %52 = arith.cmpi ne, %51, %c0_i32_22 : i32
    scf.if %52 {
      %c0_23 = arith.constant 0 : index
      %c0_24 = arith.constant 0 : index
      %53 = vector.load %arg11[%c0_23, %c0_24] : memref<16x16xf32, #tpu.memory_space<vmem>>, vector<16x16xf32>
      %c0_25 = arith.constant 0 : index
      %c0_26 = arith.constant 0 : index
      %54 = vector.load %arg10[%c0_25, %c0_26] : memref<16x16xf32, #tpu.memory_space<vmem>>, vector<16x16xf32>
      tpu.vector_store %arg10[%c0_25, %c0_26], %53 {strides = array<i32>} : memref<16x16xf32, #tpu.memory_space<vmem>>, vector<16x16xf32>,
    } else {
    }
    return
  }
  func.func @transform_0(%arg0: i32) -> (i32, i32) {
    %c0_i32 = arith.constant 0 : i32
    %c0_i32_0 = arith.constant 0 : i32
    %c0_i32_1 = arith.constant 0 : i32
    return %c0_i32, %c0_i32_0 : i32, i32
  }
  func.func @transform_1(%arg0: i32) -> (i32, i32) {
    %c0_i32 = arith.constant 0 : i32
    %c0_i32_0 = arith.constant 0 : i32
    %c0_i32_1 = arith.constant 0 : i32
    return %c0_i32, %c0_i32_0 : i32, i32
  }
  func.func @transform_2(%arg0: i32) -> (i32, i32) {
    %c0_i32 = arith.constant 0 : i32
    %c0_i32_0 = arith.constant 0 : i32
    %c0_i32_1 = arith.constant 0 : i32
    return %c0_i32, %c0_i32_0 : i32, i32
  }
  func.func @transform_3(%arg0: i32) -> (i32, i32) {
    %c0_i32 = arith.constant 0 : i32
    %c0_i32_0 = arith.constant 0 : i32
    %c0_i32_1 = arith.constant 0 : i32
    return %c0_i32, %c0_i32_0 : i32, i32
  }
  func.func @transform_4(%arg0: i32) -> (i32, i32) {
    %c0_i32 = arith.constant 0 : i32
    %c0_i32_0 = arith.constant 0 : i32
    %c0_i32_1 = arith.constant 0 : i32
    return %c0_i32, %c0_i32_0 : i32, i32
  }
  func.func @transform_5(%arg0: i32) -> (i32, i32) {
    %c0_i32 = arith.constant 0 : i32
    %c0_i32_0 = arith.constant 0 : i32
    %c0_i32_1 = arith.constant 0 : i32
    return %c0_i32, %c0_i32_0 : i32, i32
  }
  func.func @transform_6(%arg0: i32) -> (i32, i32) {
    %c0_i32 = arith.constant 0 : i32
    %c0_i32_0 = arith.constant 0 : i32
    %c0_i32_1 = arith.constant 0 : i32
    return %c0_i32, %c0_i32_0 : i32, i32
  }
  func.func @transform_7(%arg0: i32) -> (i32, i32) {
    %c0_i32 = arith.constant 0 : i32
    %c0_i32_0 = arith.constant 0 : i32
    %c0_i32_1 = arith.constant 0 : i32
    return %c0_i32, %c0_i32_0 : i32, i32
  }
  func.func @transform_8(%arg0: i32) -> (i32, i32, i32) {
    %c0_i32 = arith.constant 0 : i32
    %c0_i32_0 = arith.constant 0 : i32
    %c0_i32_1 = arith.constant 0 : i32
    return %arg0, %c0_i32, %c0_i32_0 : i32, i32, i32
  }
  func.func @transform_9(%arg0: i32) -> (i32, i32) {
    %c0_i32 = arith.constant 0 : i32
    %c0_i32_0 = arith.constant 0 : i32
    %c0_i32_1 = arith.constant 0 : i32
    return %c0_i32, %c0_i32_0 : i32, i32
  }
}

</mosaic_0001>

<bundles_post_ra>
// kernel: tpu_custom_call.1
= control target key start
LH: loop header
LB: loop body
LE: loop exit
PB: predicated region body
PF: predicated region fallthrough
CT: control target
= control target key end

     0   :  { %s1414_s0 = inlined_call_operand.hbm [shape: f32[8,8], index: 0, kind: input, shape index: {}]   ;;  %s1415_s1 = inlined_call_operand.vmem [shape: f32[16,16], index: 1, kind: input, shape index: {}]   ;;  %s1416_s2 = inlined_call_operand.hbm [shape: f32[16,16], index: 2, kind: input, shape index: {}]   ;;  %s1417_s3 = inlined_call_operand.vmem [shape: f32[16,16], index: 3, kind: input, shape index: {}]   ;;  %s1418_s4 = inlined_call_operand.hbm [shape: bf16[16,32], index: 4, kind: input, shape index: {}]   ;;  %s1419_s5 = inlined_call_operand.hbm [shape: f32[8,32], index: 5, kind: input, shape index: {}]   ;;  %s1420_s6 = inlined_call_operand.vmem [shape: bf16[32,16], index: 6, kind: input, shape index: {}]   ;;  %s1421_s7 = inlined_call_operand.vmem [shape: f32[1,16], index: 7, kind: input, shape index: {}]   ;;  %s1422_s8 = inlined_call_operand.hbm [shape: f32[8,16,16], index: 8, kind: input, shape index: {}]   ;;  %s1423_s9 = inlined_call_operand.hbm [shape: f32[16,16], index: 9, kind: output, shape index: {}]  }
   0x1   :  { %1428 = sst [smem:[#allocation19_spill]] %s1423_s9 }
   0x2   :  { %14 = vsyncpa [#allocation6], 0 }
   0x3   :  { %15 = vsyncpa [#allocation4], 0 }
   0x4   :  { %16 = vsyncpa [#allocation9], 0 }
   0x5   :  { %17 = vsyncpa [#allocation12], 0 }
   0x6   :  { %19 = vsyncpa [#allocation12 + $0x1], 0 }
   0x7   :  { %20 = vsyncpa [#allocation5], 0  ;;  %s1120_s30 = smov 0   ;;  %s1122_s10 = smov 0  }
   0x8   :  { %s1124_s11 = smov 0   ;;  %s1126_s12 = smov 0  }
   0x9 LB: > { %s1139_s13 = sadd.s32 4294967295, %s1054_s12   ;;  %p214_p0 = scmp.ne.s32.totalorder %s1046_s10, %s1042_s30  ;;  %s1054_s12 = sphi %s1126_s12, %s1447_s12   ;;  %s1050_s11 = sphi %s1124_s11, %s1446_s11   ;;  %s1046_s10 = sphi %s1122_s10, %s1445_s10   ;;  %s1042_s30 = sphi %s1120_s30, %s1444_s30  }
   0xa   : > { %p1424_p1 = scmp.eq.s32.totalorder %s1139_s13, 0  ;;  %p700_p2 = scmp.ge.s32.totalorder %s1054_s12, 1 }
   0xb   : > { %p246_p3 = scmp.lt.s32.totalorder %s1054_s12, 9  ;;  %s1056_s16 = smov [#allocation8]  }
   0xc   : > { %p1148_p5 = por %p1424_p1, %p214_p0  ;;  %s286_s17 = sshll.u32 %s1056_s16, 4  ;;  %s287_s17 = int_to_ptr.vmem [resolvable:$true] %s286_s17 }
   0xd   : > { %p1152_p6 = pnand %p700_p2, %p246_p3  ;;  %s1057_s19 = smov [#allocation7]  }
   0xe   : > { %s1429_s14 = scalar_select %p1148_p5, 1, 0 }
   0xf   : > { %s1430_s15 = scalar_select %p1152_p6, 1, 0 }
  0x10   : > { %p771_p7 = pneg %p1152_p6  ;;  %s270_s20 = sshll.u32 %s1057_s19, 4  ;;  %s1164_s20 = int_to_ptr.vmem [resolvable:$true] %s270_s20 }
  0x11   : > { %s851_s23 = scalar_lea.hbm %s1418_s4, 128 }
  0x12   : > { %p1160_p8 = pnand %p771_p7, %p1424_p1  ;;  %p852_p9 = scmp.ne.s32.totalorder %s1418_s4, %s851_s23 }
  0x13   : > { %p858_p13 = scmp.lt.u32.totalorder %s851_s23, %s1418_s4 }
  0x14   : > { %p1174_p10 = pneg %p1160_p8 }
  0x16   : > { %p854_p11 = pnand %p1174_p10, %p852_p9 }
  0x18   : > { %p855_p12 = pneg %p854_p11 }
  0x1a   : > { %p860_p0 = pnand %p858_p13, %p855_p12 }
  0x1c   : > { %863 = shalt.err (!%p860_p0)
}
  0x1d   : > { %s864_s29 = scalar_lea.vmem %s287_s17, 128  ;;  %p872_p4 = scmp.lt.s32.totalorder %s287_s17, %s287_s17 }
  0x1e   : > { %p865_p2 = scmp.ne.s32.totalorder %s287_s17, %s864_s29  ;;  %p873_p1 = scmp.lt.s32.totalorder %s864_s29, %s864_s29 }
  0x20   : > { %p867_p3 = pnand %p865_p2, %p1174_p10  ;;  %p874_p5 = por %p873_p1, %p872_p4 }
  0x22   : > { %p868_p7 = pneg %p867_p3 }
  0x24   : > { %p875_p6 = pnand %p874_p5, %p868_p7 }
  0x26   : > { %878 = shalt.err (!%p875_p6)
}
  0x27   : > { %s1058_s30 = smov 64   ;;  %s1059_s16 = smov 4  }
  0x28   : > { %780 = dma.hbm_to_vmem [thread:$0]  (!%p1160_p8), %s1418_s4, 128, %s287_s17, [#allocation9], %s1058_s30, %s1058_s30, %s1059_s16  }
  0x29   : > { %s879_s24 = scalar_lea.hbm %s1414_s0, 128 }
  0x2a   : > { %p880_p9 = scmp.ne.s32.totalorder %s1414_s0, %s879_s24  ;;  %p886_p5 = scmp.lt.u32.totalorder %s879_s24, %s1414_s0 }
  0x2c   : > { %p882_p1 = pnand %p880_p9, %p1174_p10 }
  0x2e   : > { %p883_p4 = pneg %p882_p1 }
  0x30   : > { %p888_p6 = pnand %p886_p5, %p883_p4 }
  0x32   : > { %891 = shalt.err (!%p888_p6)
}
  0x33   : > { %s1060_s9 = smov [#allocation3]   ;;  %s892_s21 = scalar_lea.hbm %s1416_s2, 256 }
  0x34   : > { %774 = dma.hbm_to_smem (!%p1160_p8), %s1414_s0, 128, %s1060_s9, [#allocation6]  }
  0x35   : > { %p893_p11 = scmp.ne.s32.totalorder %s1416_s2, %s892_s21  ;;  %p899_p0 = scmp.lt.u32.totalorder %s892_s21, %s1416_s2 }
  0x37   : > { %p895_p12 = pnand %p893_p11, %p1174_p10 }
  0x39   : > { %p896_p13 = pneg %p895_p12 }
  0x3b   : > { %p901_p2 = pnand %p899_p0, %p896_p13 }
  0x3d   : > { %904 = shalt.err (!%p901_p2)
}
  0x3e   : > { %s905_s9 = scalar_lea.vmem %s1164_s20, 256  ;;  %p913_p1 = scmp.lt.s32.totalorder %s1164_s20, %s1164_s20 }
  0x3f   : > { %p906_p3 = scmp.ne.s32.totalorder %s1164_s20, %s905_s9  ;;  %p914_p4 = scmp.lt.s32.totalorder %s905_s9, %s905_s9 }
  0x41   : > { %p908_p7 = pnand %p906_p3, %p1174_p10  ;;  %p915_p5 = por %p914_p4, %p913_p1 }
  0x43   : > { %p909_p9 = pneg %p908_p7 }
  0x45   : > { %p916_p6 = pnand %p915_p5, %p909_p9 }
  0x47   : > { %919 = shalt.err (!%p916_p6)
}
  0x48   : > { %s1061_s27 = smov 128   ;;  %s1062_s28 = smov 8  }
  0x49   : > { %777 = dma.hbm_to_vmem [thread:$0]  (!%p1160_p8), %s1416_s2, 256, %s1164_s20, [#allocation4], %s1061_s27, %s1061_s27, %s1062_s28  }
  0x4a   : > { %s1063_s30 = smov [#allocation10]   ;;  %s920_s22 = scalar_lea.hbm %s1419_s5, 128 }
  0x4b   : > { %s300_s16 = sshll.u32 %s1063_s30, 4  ;;  %p921_p11 = scmp.ne.s32.totalorder %s1419_s5, %s920_s22  ;;  %s301_s16 = int_to_ptr.vmem [resolvable:$true] %s300_s16 }
  0x4c   : > { %p927_p0 = scmp.lt.u32.totalorder %s920_s22, %s1419_s5 }
  0x4d   : > { %p923_p12 = pnand %p921_p11, %p1174_p10 }
  0x4f   : > { %p924_p13 = pneg %p923_p12 }
  0x51   : > { %p929_p2 = pnand %p927_p0, %p924_p13 }
  0x53   : > { %932 = shalt.err (!%p929_p2)
}
  0x54   : > { %s933_s20 = scalar_lea.vmem %s301_s16, 128  ;;  %p941_p1 = scmp.lt.s32.totalorder %s301_s16, %s301_s16 }
  0x55   : > { %p934_p3 = scmp.ne.s32.totalorder %s301_s16, %s933_s20  ;;  %p942_p4 = scmp.lt.s32.totalorder %s933_s20, %s933_s20 }
  0x57   : > { %p936_p7 = pnand %p934_p3, %p1174_p10  ;;  %p943_p5 = por %p942_p4, %p941_p1 }
  0x59   : > { %p937_p9 = pneg %p936_p7 }
  0x5b   : > { %p944_p6 = pnand %p943_p5, %p937_p9 }
  0x5d   : > { %947 = shalt.err (!%p944_p6)
}
  0x5e   : > { %783 = dma.hbm_to_vmem [thread:$0]  (!%p1160_p8), %s1419_s5, 128, %s301_s16, [#allocation9]  }
  0x5f   : > { %s1251_s26 = sadd.s32 1, %s1054_s12   ;;  %s201_s30 = sadd.s32 1, %s1050_s11 }
  0x60   : > { %s198_s19 = ssub.s32 %s1054_s12, %s1251_s26  ;;  %p208_p10 = scmp.ne.s32.totalorder %s1050_s11, %s1046_s10 }
  0x61   : > { %p199_p11 = scmp.eq.s32.totalorder %s198_s19, 0  ;;  %p209_p12 = scmp.eq.s32.totalorder %s1054_s12, 0 }
  0x62   : > { %p792_p13 = scmp.lt.s32.totalorder %s1054_s12, 8  ;;  %s317_s18 = sand.u32 1, %s1050_s11  }
  0x63   : > { %s1262_s21 = scalar_select %p199_p11, %s1050_s11, %s201_s30  }
  0x64   : > { %p210_p0 = por %p209_p12, %p208_p10  ;;  %s706_s22 = sshll.u32 %s317_s18, 4 }
  0x65   : > { %s729_s23 = sshll.u32 %s1054_s12, 8  ;;  %s321_s16 = scalar_lea.vmem [#allocation11], %s706_s22 }
  0x66   : > { %s1268_s9 = scalar_lea.hbm %s1422_s8, %s729_s23  ;;  %s328_s20 = sshll.u32 %s321_s16, 4  ;;  %s1274_s20 = int_to_ptr.vmem [resolvable:$true] %s328_s20 }
  0x67   : > { %p1270_p8 = pnand %p792_p13, %p210_p0  ;;  %s1276_s12 = scalar_lea.sflag [#allocation12], %s317_s18 }
  0x68   : > { %s948_s17 = scalar_lea.hbm %s1268_s9, 256  ;;  %s953_s22 = scalar_lea.hbm %s1422_s8, 2048 }
  0x69   : > { %p949_p2 = scmp.ne.s32.totalorder %s1268_s9, %s948_s17  ;;  %p950_p3 = pneg %p1270_p8 }
  0x6a   : > { %p954_p1 = scmp.lt.u32.totalorder %s1268_s9, %s1422_s8  ;;  %p955_p4 = scmp.lt.u32.totalorder %s953_s22, %s948_s17 }
  0x6b   : > { %p951_p7 = pnand %p950_p3, %p949_p2  ;;  %p957_p6 = scmp.lt.u32.totalorder %s948_s17, %s1268_s9 }
  0x6c   : > { %p956_p5 = por %p955_p4, %p954_p1 }
  0x6d   : > { %p952_p9 = pneg %p951_p7 }
  0x6e   : > { %p958_p10 = por %p957_p6, %p956_p5 }
  0x70   : > { %p959_p11 = pnand %p958_p10, %p952_p9 }
  0x72   : > { %962 = shalt.err (!%p959_p11)
}
  0x73   : > { %s963_s18 = scalar_lea.vmem %s1274_s20, 256  ;;  %s1064_s25 = smov [#allocation11]  }
  0x74   : > { %p964_p12 = scmp.ne.s32.totalorder %s1274_s20, %s963_s18  ;;  %s968_s16 = sshll.u32 %s1064_s25, 4  ;;  %s969_s16 = int_to_ptr.vmem [resolvable:$false] %s968_s16 }
  0x75   : > { %s970_s30 = scalar_lea.vmem %s969_s16, 512  ;;  %p971_p2 = scmp.lt.s32.totalorder %s1274_s20, %s969_s16 }
  0x76   : > { %p966_p13 = pnand %p964_p12, %p950_p3  ;;  %p972_p7 = scmp.lt.s32.totalorder %s970_s30, %s963_s18 }
  0x78   : > { %p967_p0 = pneg %p966_p13  ;;  %p973_p1 = por %p972_p7, %p971_p2 }
  0x7a   : > { %p974_p4 = pnand %p973_p1, %p967_p0 }
  0x7c   : > { %977 = shalt.err (!%p974_p4)
}
  0x7d   : > { %787 = dma.hbm_to_vmem [thread:$0]  (!%p1270_p8), %s1268_s9, 256, %s1274_s20, %s1276_s12, %s1061_s27, %s1061_s27, %s1062_s28  }
  0x7e   : > { %p1434_p3 = scmp.ne.s32.totalorder %s1430_s15, 0 }
  0x7f   : > { %p1435_p9 = scmp.eq.s32.totalorder (!%p1434_p3), %s1139_s13, 0 }
  0x80   : > { %340 = sbr.rel (%p1434_p3) target bundleno = 660 (0x294), region = 56 }
  0x87   : > { %1021 = dma.done.wait (%p1435_p9), [#allocation6], 128   ;;  %p1436_p5 = pmov %p1435_p9 }
  0x89   : > { %1023 = vsyncadd (%p1436_p5), [#allocation6], 4294967168  ;;  %p1437_p6 = pmov %p1436_p5 }
  0x8a   : > { %p1438_p10 = pmov %p1436_p5 }
  0x8b   : > { %1025 = dma.done.wait (%p1437_p6), [#allocation4], 256  }
  0x8c   : > { %1027 = vsyncadd (%p1438_p10), [#allocation4], 4294967040  ;;  %p1439_p11 = pmov %p1436_p5 }
  0x8d   : > { %p1440_p8 = pmov %p1436_p5 }
  0x8e   : > { %1029 = dma.done.wait (%p1439_p11), [#allocation9], 256  }
  0x8f   : > { %1031 = vsyncadd (%p1440_p8), [#allocation9], 4294967040  ;;  %s358_s15 = sand.u32 1, %s1046_s10   ;;  %p1441_p12 = scmp.ne.s32.totalorder %s1429_s14, 0 }
  0x90   : > { %s1322_s27 = sshll.u32 %s358_s15, 4  ;;  %s359_s28 = scalar_lea.sflag [#allocation12], %s358_s15 }
  0x91   : > { %s362_s9 = scalar_lea.vmem [#allocation11], %s1322_s27 }
  0x92   : > { %1033 = dma.done.wait (%p1441_p12), %s359_s28, 256  }
  0x93   : > { %1035 = vsyncadd (%p1441_p12), %s359_s28, 4294967040 }
  0x94   : > { %367 = sfence }
  0x95   : > { %s394_s20 = ssub.s32 7, %s1139_s13  ;;  %p1442_p13 = scmp.ne.s32.totalorder %s1139_s13, 0 }
  0x96   : > { %v399_v0 = vld [vmem:[%s1417_s3] sm:$0xff] (!%p1442_p13)  ;;  %v403_v1 = vld [vmem:[#allocation7] sm:$0xff] (!%p1442_p13)  ;;  %vm409_vm0 = vcmask (!%p1442_p13), 130048   ;;  %v400_v3 = vld [vmem:[%s1417_s3 + $0x8] sm:$0xff] (!%p1442_p13) }
  0x97   : > { %398 = sbr.rel (%p1442_p13) target bundleno = 158 (0x9e), region = 80  ;;  %v405_v2 = vld [vmem:[%s1415_s1] sm:$0xff] (!%p1442_p13)  ;;  %vm401_vm1 = vcmp.gt.f32.partialorder (!%p1442_p13), %v399_v0, 0.5  ;;  %v404_v4 = vld [vmem:[#allocation7 + $0x8] sm:$0xff] (!%p1442_p13)  ;;  %v406_v5 = vld [vmem:[%s1415_s1 + $0x8] sm:$0xff] (!%p1442_p13)  ;;  %vm402_vm2 = vcmp.gt.f32.partialorder (!%p1442_p13), %v400_v3, 0.5 }
  0x98   : > { %v407_v6 = vsel (!%p1442_p13), %vm401_vm1, %v403_v1, %v405_v2  ;;  %v408_v7 = vsel (!%p1442_p13), %vm402_vm2, %v404_v4, %v406_v5 }
  0x99   : > { %410 = vst.msk [vmem:[#allocation2] sm:$0xff] (!%p1442_p13), %vm409_vm0, %v407_v6  ;;  %411 = vst.msk [vmem:[#allocation2 + $0x8] sm:$0xff] (!%p1442_p13), %vm409_vm0, %v408_v7 }
  0x9e PF: > { %v844_v8 = vld [vmem:[#allocation8] sm:$0xff]   ;;  %v1065_v9 = vmov 0.0   ;;  %vm1066_vm3 = vmmov 0   ;;  %vm429_vm4 = vcmask 130048   ;;  %v846_v14 = vld [vmem:[%s1420_s6 + $0x8] sm:$0xff]   ;;  %s414_s15 = scalar_lea.vmem [#allocation10], %s394_s20 }
  0x9f   : > { %735 = vmatprep.subr.bf16.mxu0 %v1065_v9  ;;  %741 = vmatprep.subr.bf16.mxu1 %v1065_v9  ;;  %v845_v13 = vld [vmem:[%s1420_s6] sm:$0xff]   ;;  %vm500_vm5 = vcmask 261120   ;;  %s723_s28 = sshll.u32 %s394_s20, 7  ;;  %v572_v44 = vld [vmem:[%s362_s9 + $0x8] sm:$0xff]  ;;  %v582_v54 = vld [vmem:[#allocation7] sm:$0xff]  ;;  %p724_p0 = scmp.ne.s32.totalorder %s1139_s13, 7 }
  0xa0   : > { %v412_v10 = vld [vmem:[#allocation2] sm:$0xff]  ;;  %v1344_v11 = vld [vmem:[#allocation2 + $0x8] sm:$0xff]  ;;  %736 = vmatpush3.bf16.msra.mxu0 %v844_v8  ;;  %737 = vmatprep.mubr.msk.bf16.mxu0 %vm1066_vm3, %v1065_v9  ;;  %s547_s29 = sadd.s32 1, %s723_s28  ;;  %s546_s12 = sld [smem:[#allocation3 + %s723_s28]]  ;;  %v583_v57 = vld [vmem:[#allocation7 + $0x8] sm:$0xff] }
  0xa1   : > { %v416_v12 = vpack.c.bf16 %v1344_v11, %v412_v10  ;;  %745 = vmatprep.mubr.msk.bf16.mxu1 %vm1066_vm3, %v1065_v9  ;;  %742 = vmatpush3.bf16.msra.mxu1 %v845_v13  ;;  %v716_v15 = vld [vmem:[%s414_s15] ss:$0 sm:$0xff]  ;;  %s551_s17 = sadd.s32 3, %s723_s28  ;;  %s548_s19 = sld [smem:[#allocation3 + %s547_s29]]  ;;  %v579_v53 = vld [vmem:[%s1417_s3 + $0x8] sm:$0xff] }
  0xa2   : > { %743 = vmatprep.subr.bf16.mxu1 %v1065_v9  ;;  %s549_s22 = sadd.s32 2, %s723_s28  ;;  %s553_s14 = sadd.s32 4, %s723_s28  ;;  %v719_v25 = vld [vmem:[%s1421_s7] ss:$0 sm:$0xff]  ;;  %vm581_vm7 = vcmp.gt.f32.partialorder %v579_v53, 0.5 }
  0xa3   : > { %738 = vmatmul.mubr.msk.bf16.vlgmr.msra.gmra.mrb[0].mxu0 %vm429_vm4, %v416_v12  ;;  %s552_s23 = sld [smem:[#allocation3 + %s551_s17]]  ;;  %v571_v39 = vld [vmem:[%s362_s9] sm:$0xff] }
  0xa4   : > { %s550_s24 = sld [smem:[#allocation3 + %s549_s22]]  ;;  %v578_v47 = vld [vmem:[%s1417_s3] sm:$0xff] }
  0xa5   : > { %744 = vmatpush3.bf16.msra.mxu1 %v846_v14  ;;  %s554_s18 = sld [smem:[#allocation3 + %s553_s14]]  ;;  %vm580_vm6 = vcmp.gt.f32.partialorder %v578_v47, 0.5 }
  0xa6   : > { %v555_v26 = vstv %s546_s12 }
  0xa7   : > { %v558_v28 = vstv %s548_s19  ;;  %v556_v30 = vmul.f32 %v555_v26, %v412_v10  ;;  %v557_v36 = vmul.f32 %v555_v26, %v1344_v11 }
  0xa9   : > { %v566_v32 = vstv %s552_s23 }
  0xaa   : > { %v563_v38 = vstv %s550_s24  ;;  %v567_v42 = vmul.f32 %v566_v32, %v412_v10  ;;  %v568_v49 = vmul.f32 %v566_v32, %v1344_v11 }
  0xab   : > { %v573_v40 = vstv %s554_s18 }
  0xac   : > { %v574_v46 = vmul.f32 %v573_v40, %v571_v39  ;;  %v575_v52 = vmul.f32 %v573_v40, %v572_v44 }
 0x176   : > { %v467_v16 = vpop.f32.mrb[0].mxu0 }
 0x177   : > { %v468_v17 = vadd.f32 %v716_v15, %v467_v16  ;;  %v739_v18 = vpop.f32.mrb[1].mxu0 }
 0x178   : > { %v470_v19 = vpop.f32.mrb[2].mxu0 }
 0x179   : > { %v471_v20 = vadd.f32 %v716_v15, %v470_v19  ;;  %v740_v21 = vpop.f32.mrb[3].mxu0  ;;  %847 = vtanh.f32 %v468_v17 }
 0x17b   : > { %849 = vtanh.f32 %v471_v20 }
 0x183   : > { %v848_v22 = vpop.eup %847 }
 0x185   : > { %v850_v23 = vpop.eup %849 }
 0x186   : > { %v476_v24 = vpack.c.bf16 %v850_v23, %v848_v22 }
 0x188   : > { %746 = vmatmul.mubr.msk.bf16.vlgmr.msra.gmra.mrb[0].mxu1 %vm500_vm5, %v476_v24 }
 0x25b   : > { %v538_v27 = vpop.f32.mrb[0].mxu1 }
 0x25c   : > { %v539_v29 = vadd.f32 %v719_v25, %v538_v27  ;;  %v747_v31 = vpop.f32.mrb[1].mxu1 }
 0x25d   : > { %v541_v33 = vpop.f32.mrb[2].mxu1 }
 0x25e   : > { %v559_v34 = vmul.f32 %v558_v28, %v539_v29  ;;  %v542_v35 = vadd.f32 %v719_v25, %v541_v33  ;;  %v748_v37 = vpop.f32.mrb[3].mxu1 }
 0x260   : > { %v561_v41 = vsub.f32 %v556_v30, %v559_v34  ;;  %v560_v43 = vmul.f32 %v558_v28, %v542_v35 }
 0x262   : > { %v564_v45 = vmul.f32 %v563_v38, %v561_v41  ;;  %v562_v48 = vsub.f32 %v557_v36, %v560_v43 }
 0x264   : > { %v569_v50 = vadd.f32 %v567_v42, %v564_v45  ;;  %v565_v51 = vmul.f32 %v563_v38, %v562_v48 }
 0x265   : > { %591 = sbr.rel (%p724_p0) target bundleno = 628 (0x274), region = 84 }
 0x266   : > { %v576_v55 = vadd.f32 %v574_v46, %v569_v50  ;;  %v570_v56 = vadd.f32 %v568_v49, %v565_v51 }
 0x268   : > { %v584_v58 = vsel %vm580_vm6, %v582_v54, %v576_v55  ;;  %v577_v59 = vadd.f32 %v575_v52, %v570_v56 }
 0x269   : > { %586 = vst.msk [vmem:[#allocation2] sm:$0xff] %vm429_vm4, %v584_v58 }
 0x26a   : > { %v585_v60 = vsel %vm581_vm7, %v583_v57, %v577_v59 }
 0x26b   : > { %587 = vst.msk [vmem:[#allocation2 + $0x8] sm:$0xff] %vm429_vm4, %v585_v60 }
 0x270   : > { %v592_v61 = vld [vmem:[#allocation2] sm:$0xff] }
 0x271   : > { %594 = vst.msk [vmem:[#allocation13] sm:$0xff] %vm429_vm4, %v592_v61 }
 0x272   : > { %v593_v62 = vld [vmem:[#allocation2 + $0x8] sm:$0xff] }
 0x273   : > { %595 = vst.msk [vmem:[#allocation13 + $0x8] sm:$0xff] %vm429_vm4, %v593_v62 }
 0x274 PF: > { %p797_p2 = scmp.eq.s32.totalorder %s1139_s13, 7  ;;  %s1067_s27 = smov [#allocation13]  }
 0x275   : > { %s602_s9 = sshll.u32 %s1067_s27, 4  ;;  %s603_s9 = int_to_ptr.vmem [resolvable:$true] %s602_s9 }
 0x276   : > { %s978_s29 = scalar_lea.vmem %s603_s9, 256  ;;  %p985_p3 = scmp.lt.s32.totalorder %s603_s9, %s603_s9 }
 0x277   : > { %p979_p7 = scmp.ne.s32.totalorder %s603_s9, %s978_s29  ;;  %p986_p9 = scmp.lt.s32.totalorder %s978_s29, %s978_s29 }
 0x279   : > { %p980_p1 = pnand %p979_p7, %p797_p2  ;;  %p987_p5 = por %p986_p9, %p985_p3 }
 0x27b   : > { %p981_p4 = pneg %p980_p1 }
 0x27d   : > { %p988_p6 = pnand %p987_p5, %p981_p4 }
 0x27f   : > { %991 = shalt.err (!%p988_p6)
}
 0x280   : > { %s1443_s19 = sld [smem:[#allocation19_spill]] }
 0x286   : > { %s992_s22 = scalar_lea.hbm %s1443_s19, 256 }
 0x287   : > { %p993_p10 = scmp.ne.s32.totalorder %s1443_s19, %s992_s22  ;;  %p998_p12 = scmp.lt.u32.totalorder %s992_s22, %s1443_s19 }
 0x289   : > { %p994_p11 = pnand %p993_p10, %p797_p2 }
 0x28b   : > { %p995_p8 = pneg %p994_p11 }
 0x28d   : > { %p1000_p13 = pnand %p998_p12, %p995_p8 }
 0x28f   : > { %1003 = shalt.err (!%p1000_p13)
}
 0x290   : > { %s1068_s25 = smov 128   ;;  %s1069_s16 = smov 8  }
 0x291   : > { %768 = dma.vmem_to_hbm [thread:$0]  (%p797_p2), %s603_s9, 256, %s1443_s19, [#allocation5], %s1068_s25, %s1068_s25, %s1069_s16  }
 0x292   : > { %1037 = dma.done.wait (%p797_p2), [#allocation5], 256  }
 0x293   : > { %1039 = vsyncadd (%p797_p2), [#allocation5], 4294967040 }
 0x294 PF: > { %p23_p0 = scmp.ge.s32.totalorder %s1251_s26, 10   ;;  %s1444_s30 = smov %s1046_s10 }
 0x295   : > { %s1445_s10 = smov %s1050_s11  ;;  %s1446_s11 = smov %s1262_s21 }
 0x296   : > { %s1447_s12 = smov %s1251_s26  ;;  %25 = sbr.rel (!%p23_p0) target bundleno = 9 (0x9), region = 120 }
 0x29d   :  { %618 = vsyncpa [#allocation4], 1 }
 0x29e   :  { %620 = vsyncpa [#allocation4 + $0x1], 1 }
 0x29f   :  { %621 = vsyncpa [#allocation9], 1 }
 0x2a0   :  { %622 = vsyncpa [#allocation12], 1 }
 0x2a1   :  { %624 = vsyncpa [#allocation12 + $0x1], 1 }
 0x2a2   :  { %625 = vsyncpa [#allocation5], 1 }
 0x2a3   :  { %627 = vsyncpa [#allocation5 + $0x1], 1 }
 0x2a4   :  { %628 = vsyncpa [#allocation6], 1 }
 0x2a5   :  { %630 = vsyncpa [#allocation6 + $0x1], 1 }

</bundles_post_ra>
